<compile_context>
chip_gen: v7x
topology: tpu7x:2x2x1
jax: 0.10.0
libtpu: 0.0.40
codegen_flags: <defaults>
</compile_context>

<pallas_src>
import functools

import jax
import jax.numpy as jnp
from jax import lax
from jax.experimental import pallas as pl
from jax.experimental.pallas import tpu as pltpu


def _dit_final_kernel(x_ref, mod_ref, w_ref, b_ref, o_ref, *, eps):
    # x_ref:   (TT, H)     mod_ref: (2, H)   [row 0 = shift, row 1 = 1+scale]
    # w_ref:   (H, Dp)     b_ref:   (1, D)
    # o_ref:   (TT, D)
    x = x_ref[...].astype(jnp.float32)                        # (TT, H)
    inv_h = 1.0 / x.shape[-1]

    # LayerNorm (no affine, eps=1e-6), two-pass: robust to cancellation.
    mean = jnp.sum(x, axis=-1, keepdims=True) * inv_h         # (TT, 1)
    xm = x - mean
    var = jnp.sum(xm * xm, axis=-1, keepdims=True) * inv_h    # (TT, 1)
    inv_std = lax.rsqrt(var + eps)

    m = mod_ref[...].astype(jnp.float32)                      # (2, H)
    shift = m[0:1, :]                                         # (1, H)
    scale1 = m[1:2, :]                                        # (1, H) == 1 + scale

    # scale_and_shift: xn * (1 + scale) + shift  (broadcast over tokens)
    y = xm * inv_std * scale1 + shift                         # (TT, H)

    # Final linear on the MXU in the stored weight dtype (bf16 by default),
    # f32 accumulation.  Output columns beyond D are zero-padding -> dropped.
    y = y.astype(w_ref.dtype)
    acc = jnp.dot(y, w_ref[...], preferred_element_type=jnp.float32)  # (TT, Dp)

    d = o_ref.shape[-1]
    out = acc[:, :d] + b_ref[...].astype(jnp.float32)         # (TT, D)
    o_ref[...] = out.astype(o_ref.dtype)


def _vmem_budget_bytes():
    """Generation-aware VMEM cap: ~half of physical, <= 48 MiB."""
    phys = 128 << 20
    try:
        info = pltpu.get_tpu_info()
        phys = int(getattr(info, "vmem_capacity_bytes", phys) or phys)
    except Exception:
        pass
    # v5e/v6e (128 MiB) -> 48 MiB; v7x (64 MiB per TC) -> 32 MiB.
    return int(min(phys // 2, 48 << 20))


def _choose_token_tile(T, H, D, Dp, x_isz, w_isz, out_isz, budget):
    """Largest token tile whose pipelined footprint fits the VMEM budget."""
    fixed = (2 * (H * Dp) * w_isz        # weight (count 2x: default buffering)
             + 2 * D * 4                 # bias
             + 2 * 2 * H * 4             # packed shift / 1+scale
             + (2 << 20))                # slack for Mosaic internals

    def tile_bytes(tt):
        return (2 * tt * H * x_isz       # x tile, double-buffered
                + 2 * tt * D * out_isz   # out tile, double-buffered
                + 3 * tt * H * 4         # f32 temporaries (x32, centered, y)
                + tt * Dp * 4)           # f32 matmul result

    if T <= 1024 and fixed + tile_bytes(T) <= budget:
        return T                          # full-T block: always layout-legal
    for tt in (1024, 512, 256, 128, 64, 32, 16, 8):
        if tt <= T and fixed + tile_bytes(tt) <= budget:
            return tt
    return 8 if T >= 8 else T


def dit_final_layer(x, c, w_mod, b_mod, w_lin, b_lin, *, eps=1e-6,
                    mxu_dtype=jnp.bfloat16):
    """x: (B, T, H), c: (B, H), w_mod: (H, 2H), b_mod: (2H,),
       w_lin: (H, D), b_lin: (D,)  ->  (B, T, D)"""
    B, T, H = x.shape
    D = w_lin.shape[1]

    # ---- adaLN modulation hoisted out of the kernel (plain XLA, f32) --------
    c32 = c.astype(jnp.float32)
    silu_c = c32 * jax.nn.sigmoid(c32)
    mod = silu_c @ w_mod.astype(jnp.float32) + b_mod.astype(jnp.float32)  # (B, 2H)
    shift = mod[:, :H]
    scale1 = 1.0 + mod[:, H:]                                             # hoisted +1
    mod_pk = jnp.stack([shift, scale1], axis=1)                           # (B, 2, H) f32

    # ---- lane-pad ONLY the weight for the MXU; output stays at true D -------
    Dp = ((D + 127) // 128) * 128
    w_pad = w_lin if Dp == D else jnp.pad(w_lin, ((0, 0), (0, Dp - D)))
    w_pad = w_pad.astype(mxu_dtype)                                       # (H, Dp)
    b2 = b_lin.reshape(1, D).astype(jnp.float32)                          # (1, D)

    # ---- tiling / VMEM budget ------------------------------------------------
    budget = _vmem_budget_bytes()
    x_isz = x.dtype.itemsize
    w_isz = w_pad.dtype.itemsize
    TT = _choose_token_tile(T, H, D, Dp, x_isz, w_isz, x_isz, budget)
    nt = pl.cdiv(T, TT)
    grid = (nt, B)   # token axis outermost: splits across v7x's 2 TCs even at B==1

    cost = pl.CostEstimate(
        flops=2 * B * T * H * Dp,
        transcendentals=0,
        bytes_accessed=(B * T * H * x_isz       # x read
                        + B * T * D * x_isz     # out write (unpadded)
                        + H * Dp * w_isz + D * 4
                        + B * 2 * H * 4),
    )

    kernel = functools.partial(_dit_final_kernel, eps=eps)

    return pl.pallas_call(
        kernel,
        out_shape=jax.ShapeDtypeStruct((B, T, D), x.dtype),
        grid_spec=pltpu.PrefetchScalarGridSpec(
            num_scalar_prefetch=0,
            grid=grid,
            in_specs=[
                pl.BlockSpec((pl.Squeezed(), TT, H), lambda t, b: (b, t, 0)),  # x
                pl.BlockSpec((pl.Squeezed(), 2, H), lambda t, b: (b, 0, 0)),   # shift / 1+scale
                pl.BlockSpec((H, Dp), lambda t, b: (0, 0)),                    # w_lin (padded)
                pl.BlockSpec((1, D), lambda t, b: (0, 0)),                     # b_lin
            ],
            out_specs=pl.BlockSpec((pl.Squeezed(), TT, D), lambda t, b: (b, t, 0)),
        ),
        compiler_params=pltpu.CompilerParams(
            dimension_semantics=("parallel", "parallel"),
            vmem_limit_bytes=int(budget)),
        cost_estimate=cost,
    )(x, mod_pk, w_pad, b2)


def _reference(x, c, w_mod, b_mod, w_lin, b_lin, eps=1e-6):
    silu_c = c * jax.nn.sigmoid(c)
    mod = silu_c @ w_mod + b_mod
    H = x.shape[-1]
    shift, scale = mod[:, :H], mod[:, H:]
    mean = jnp.mean(x, axis=-1, keepdims=True)
    var = jnp.mean((x - mean) ** 2, axis=-1, keepdims=True)
    xn = (x - mean) / jnp.sqrt(var + eps)
    y = xn * (1 + scale[:, None, :]) + shift[:, None, :]
    return y @ w_lin + b_lin


if __name__ == "__main__":
    # Shapes consistent with DiTFinalLayer(hidden_size=32, patch_size=2, out_channels=4)
    B, T, H = 2, 8, 32
    patch_size, out_channels = 2, 4
    D = patch_size * patch_size * out_channels   # 16

    key = jax.random.PRNGKey(0)
    k_x, k_c, k_wm, k_bm, k_wl, k_bl = jax.random.split(key, 6)

    x = jax.random.normal(k_x, (B, T, H), dtype=jnp.float32)
    c = jax.random.normal(k_c, (B, H), dtype=jnp.float32)

    # Parameters stored pre-transposed: (in, out)
    w_mod = jax.random.normal(k_wm, (H, 2 * H), dtype=jnp.float32) * 0.02
    b_mod = jax.random.normal(k_bm, (2 * H,), dtype=jnp.float32) * 0.02
    w_lin = jax.random.normal(k_wl, (H, D), dtype=jnp.float32) * 0.02
    b_lin = jax.random.normal(k_bl, (D,), dtype=jnp.float32) * 0.02

    out = dit_final_layer(x, c, w_mod, b_mod, w_lin, b_lin)   # bf16 MXU operands
    out = jax.block_until_ready(out)

    ref = _reference(x, c, w_mod, b_mod, w_lin, b_lin)
    assert out.shape == (B, T, D), out.shape
    # Tolerance sized for the bf16-operand / f32-accumulate MXU path.
    assert jnp.allclose(out, ref, atol=1e-2, rtol=1e-2), \
        float(jnp.max(jnp.abs(out - ref)))

    print("KERNEL_OK")
</pallas_src>

<mosaic_0001>
module attributes {stable_mosaic.version = 11 : i64} {
  func.func @_dit_final_kernel(%arg0: i32, %arg1: i32, %arg2: memref<1x8x32xf32, #tpu.memory_space<vmem>>, %arg3: memref<1x2x32xf32, #tpu.memory_space<vmem>>, %arg4: memref<32x128xbf16, #tpu.memory_space<vmem>>, %arg5: memref<1x16xf32, #tpu.memory_space<vmem>>, %arg6: memref<1x8x16xf32, #tpu.memory_space<vmem>>) attributes {dimension_semantics = [#tpu.dimension_semantics<parallel>, #tpu.dimension_semantics<parallel>], iteration_bounds = array<i64: 1, 2>, scalar_prefetch = 0 : i64, scratch_operands = 0 : i64, tpu.core_type = #tpu.core_type<tc>, window_params = [{transform_indices = @transform_0, window_bounds = array<i64: 1, 8, 32>}, {transform_indices = @transform_1, window_bounds = array<i64: 1, 2, 32>}, {pipeline_mode = #tpu.pipeline_mode<synchronous>, transform_indices = @transform_2, window_bounds = array<i64: 32, 128>}, {pipeline_mode = #tpu.pipeline_mode<synchronous>, transform_indices = @transform_3, window_bounds = array<i64: 1, 16>}, {transform_indices = @transform_4, window_bounds = array<i64: 1, 8, 16>}]} {
    %c0 = arith.constant 0 : index
    %c0_0 = arith.constant 0 : index
    %c0_1 = arith.constant 0 : index
    %0 = vector.load %arg2[%c0, %c0_0, %c0_1] : memref<1x8x32xf32, #tpu.memory_space<vmem>>, vector<1x8x32xf32>
    %1 = vector.shape_cast %0 : vector<1x8x32xf32> to vector<8x32xf32>
    %cst = arith.constant dense<0.000000e+00> : vector<8xf32>
    %2 = vector.multi_reduction <add>, %1, %cst [1] : vector<8x32xf32> to vector<8xf32>
    %3 = vector.shape_cast %2 : vector<8xf32> to vector<8x1xf32>
    %cst_2 = arith.constant 3.125000e-02 : f32
    %4 = vector.broadcast %cst_2 : f32 to vector<8x1xf32>
    %5 = arith.mulf %3, %4 : vector<8x1xf32>
    %6 = vector.broadcast %5 : vector<8x1xf32> to vector<8x32xf32>
    %7 = arith.subf %1, %6 : vector<8x32xf32>
    %8 = arith.mulf %7, %7 : vector<8x32xf32>
    %cst_3 = arith.constant dense<0.000000e+00> : vector<8xf32>
    %9 = vector.multi_reduction <add>, %8, %cst_3 [1] : vector<8x32xf32> to vector<8xf32>
    %10 = vector.shape_cast %9 : vector<8xf32> to vector<8x1xf32>
    %cst_4 = arith.constant 3.125000e-02 : f32
    %11 = vector.broadcast %cst_4 : f32 to vector<8x1xf32>
    %12 = arith.mulf %10, %11 : vector<8x1xf32>
    %cst_5 = arith.constant 9.99999997E-7 : f32
    %13 = vector.broadcast %cst_5 : f32 to vector<8x1xf32>
    %14 = arith.addf %12, %13 : vector<8x1xf32>
    %15 = math.rsqrt %14 : vector<8x1xf32>
    %c0_6 = arith.constant 0 : index
    %c0_7 = arith.constant 0 : index
    %c0_8 = arith.constant 0 : index
    %16 = vector.load %arg3[%c0_6, %c0_7, %c0_8] : memref<1x2x32xf32, #tpu.memory_space<vmem>>, vector<1x2x32xf32>
    %17 = vector.shape_cast %16 : vector<1x2x32xf32> to vector<2x32xf32>
    %18 = vector.extract_strided_slice %17 {offsets = [0, 0], sizes = [1, 32], strides = [1, 1]} : vector<2x32xf32> to vector<1x32xf32>
    %19 = vector.extract_strided_slice %17 {offsets = [1, 0], sizes = [1, 32], strides = [1, 1]} : vector<2x32xf32> to vector<1x32xf32>
    %20 = vector.broadcast %15 : vector<8x1xf32> to vector<8x32xf32>
    %21 = arith.mulf %7, %20 : vector<8x32xf32>
    %22 = vector.broadcast %19 : vector<1x32xf32> to vector<8x32xf32>
    %23 = arith.mulf %21, %22 : vector<8x32xf32>
    %24 = vector.broadcast %18 : vector<1x32xf32> to vector<8x32xf32>
    %25 = arith.addf %23, %24 : vector<8x32xf32>
    %26 = arith.truncf %25 : vector<8x32xf32> to vector<8x32xbf16>
    %c0_9 = arith.constant 0 : index
    %c0_10 = arith.constant 0 : index
    %27 = vector.load %arg4[%c0_9, %c0_10] : memref<32x128xbf16, #tpu.memory_space<vmem>>, vector<32x128xbf16>
    %cst_11 = arith.constant dense<0.000000e+00> : vector<8x128xf32>
    %28 = tpu.matmul %26, %27, %cst_11 {dimension_numbers = #tpu.dot_dimension_numbers<[1], [0], [0], [1], [0, 0, 1, 1], [], []>} : vector<8x32xbf16>, vector<32x128xbf16>, vector<8x128xf32> -> vector<8x128xf32>
    %29 = vector.extract_strided_slice %28 {offsets = [0, 0], sizes = [8, 16], strides = [1, 1]} : vector<8x128xf32> to vector<8x16xf32>
    %c0_12 = arith.constant 0 : index
    %c0_13 = arith.constant 0 : index
    %30 = vector.load %arg5[%c0_12, %c0_13] : memref<1x16xf32, #tpu.memory_space<vmem>>, vector<1x16xf32>
    %31 = vector.broadcast %30 : vector<1x16xf32> to vector<8x16xf32>
    %32 = arith.addf %29, %31 : vector<8x16xf32>
    %c0_14 = arith.constant 0 : index
    %c0_15 = arith.constant 0 : index
    %c0_16 = arith.constant 0 : index
    %33 = vector.load %arg6[%c0_14, %c0_15, %c0_16] : memref<1x8x16xf32, #tpu.memory_space<vmem>>, vector<1x8x16xf32>
    %34 = vector.shape_cast %33 : vector<1x8x16xf32> to vector<8x16xf32>
    %35 = vector.shape_cast %32 : vector<8x16xf32> to vector<1x8x16xf32>
    tpu.vector_store %arg6[%c0_14, %c0_15, %c0_16], %35 {strides = array<i32>} : memref<1x8x16xf32, #tpu.memory_space<vmem>>, vector<1x8x16xf32>,
    return
  }
  func.func @transform_0(%arg0: i32, %arg1: i32) -> (i32, i32, i32) {
    %c0_i32 = arith.constant 0 : i32
    %c0_i32_0 = arith.constant 0 : i32
    return %arg1, %arg0, %c0_i32 : i32, i32, i32
  }
  func.func @transform_1(%arg0: i32, %arg1: i32) -> (i32, i32, i32) {
    %c0_i32 = arith.constant 0 : i32
    %c0_i32_0 = arith.constant 0 : i32
    %c0_i32_1 = arith.constant 0 : i32
    return %arg1, %c0_i32, %c0_i32_0 : i32, i32, i32
  }
  func.func @transform_2(%arg0: i32, %arg1: i32) -> (i32, i32) {
    %c0_i32 = arith.constant 0 : i32
    %c0_i32_0 = arith.constant 0 : i32
    %c0_i32_1 = arith.constant 0 : i32
    return %c0_i32, %c0_i32_0 : i32, i32
  }
  func.func @transform_3(%arg0: i32, %arg1: i32) -> (i32, i32) {
    %c0_i32 = arith.constant 0 : i32
    %c0_i32_0 = arith.constant 0 : i32
    %c0_i32_1 = arith.constant 0 : i32
    return %c0_i32, %c0_i32_0 : i32, i32
  }
  func.func @transform_4(%arg0: i32, %arg1: i32) -> (i32, i32, i32) {
    %c0_i32 = arith.constant 0 : i32
    %c0_i32_0 = arith.constant 0 : i32
    return %arg1, %arg0, %c0_i32 : i32, i32, i32
  }
}

</mosaic_0001>

<bundles_post_ra>
// kernel: tpu_custom_call.1
= control target key start
LH: loop header
LB: loop body
LE: loop exit
PB: predicated region body
PF: predicated region fallthrough
CT: control target
= control target key end

     0   :  { %s1101_s0 = inlined_call_operand.hbm [shape: f32[2,8,32], index: 0, kind: input, shape index: {}]   ;;  %s1102_s1 = inlined_call_operand.hbm [shape: f32[2,2,32], index: 1, kind: input, shape index: {}]   ;;  %s1103_s2 = inlined_call_operand.hbm [shape: bf16[32,128], index: 2, kind: input, shape index: {}]   ;;  %s1104_s3 = inlined_call_operand.vmem [shape: f32[1,16], index: 3, kind: input, shape index: {}]   ;;  %s1105_s4 = inlined_call_operand.hbm [shape: f32[2,8,16], index: 4, kind: output, shape index: {}]  }
   0x1   :  { %1110 = sst [smem:[#allocation13_spill]] %s1101_s0 }
   0x2   :  { %1111 = sst [smem:[#allocation14_spill]] %s1103_s2 }
   0x3   :  { %9 = vsyncpa [#allocation3], 0 }
   0x4   :  { %11 = vsyncpa [#allocation3 + $0x1], 0 }
   0x5   :  { %12 = vsyncpa [#allocation6], 0 }
   0x6   :  { %14 = vsyncpa [#allocation6 + $0x1], 0 }
   0x7   :  { %15 = vsyncpa [#allocation4], 0 }
   0x8   :  { %17 = vsyncpa [#allocation4 + $0x1], 0  ;;  %s837_s15 = smov 0   ;;  %s839_s16 = smov 0  }
   0x9   :  { %s841_s17 = smov 0   ;;  %s843_s18 = smov 0  }
   0xa   :  { %s845_s19 = smov 0   ;;  %s847_s20 = smov 0  }
   0xb LB: > { %s868_s21 = sadd.s32 4294967295, %s802_s20   ;;  %s506_s22 = sadd.s32 4294967294, %s802_s20   ;;  %s802_s20 = sphi %s847_s20, %s23_s20   ;;  %s798_s19 = sphi %s845_s19, %s1134_s19   ;;  %s794_s18 = sphi %s843_s18, %s1133_s18   ;;  %s790_s17 = sphi %s841_s17, %s1132_s17   ;;  %s786_s16 = sphi %s839_s16, %s1131_s16   ;;  %s782_s15 = sphi %s837_s15, %s1130_s15  }
   0xc   : > { %p57_p0 = scmp.ne.s32.totalorder %s786_s16, %s782_s15  ;;  %p1106_p1 = scmp.eq.s32.totalorder %s868_s21, 0 }
   0xd   : > { %p157_p3 = scmp.eq.s32.totalorder %s506_s22, 1  ;;  %p507_p5 = scmp.ge.s32.totalorder %s802_s20, 1 }
   0xe   : > { %p877_p4 = por %p1106_p1, %p57_p0  ;;  %p164_p7 = scmp.lt.s32.totalorder %s802_s20, 3 }
   0xf   : > { %p882_p6 = por %p157_p3, %p57_p0  ;;  %s804_s26 = smov [#allocation7]  }
  0x10   : > { %s1112_s23 = scalar_select %p877_p4, 1, 0 }
  0x11   : > { %s1113_s24 = scalar_select %p882_p6, 1, 0 }
  0x12   : > { %p887_p8 = pnand %p507_p5, %p164_p7  ;;  %s176_s27 = sshll.u32 %s804_s26, 4  ;;  %s177_s27 = int_to_ptr.vmem [resolvable:$true] %s176_s27 }
  0x13   : > { %s32_s29 = sadd.s32 1, %s798_s19  ;;  %s1116_s2 = sld [smem:[#allocation14_spill]] }
  0x14   : > { %s1114_s25 = scalar_select %p887_p8, 1, 0 }
  0x15   : > { %p548_p9 = pneg %p887_p8 }
  0x17   : > { %p896_p11 = pnand %p548_p9, %p1106_p1 }
  0x19   : > { %s624_s6 = scalar_lea.hbm %s1116_s2, 256  ;;  %p626_p13 = pneg %p896_p11 }
  0x1a   : > { %p625_p12 = scmp.ne.s32.totalorder %s1116_s2, %s624_s6  ;;  %p631_p5 = scmp.lt.u32.totalorder %s624_s6, %s1116_s2 }
  0x1c   : > { %p627_p0 = pnand %p626_p13, %p625_p12 }
  0x1e   : > { %p628_p3 = pneg %p627_p0 }
  0x20   : > { %p633_p7 = pnand %p631_p5, %p628_p3 }
  0x22   : > { %636 = shalt.err (!%p633_p7)
}
  0x23   : > { %s637_s11 = scalar_lea.vmem %s177_s27, 256  ;;  %p645_p2 = scmp.lt.s32.totalorder %s177_s27, %s177_s27 }
  0x24   : > { %p638_p9 = scmp.ne.s32.totalorder %s177_s27, %s637_s11  ;;  %p646_p6 = scmp.lt.s32.totalorder %s637_s11, %s637_s11 }
  0x26   : > { %p640_p10 = pnand %p638_p9, %p626_p13  ;;  %p647_p4 = por %p646_p6, %p645_p2 }
  0x28   : > { %p641_p1 = pneg %p640_p10 }
  0x2a   : > { %p648_p8 = pnand %p647_p4, %p641_p1 }
  0x2c   : > { %651 = shalt.err (!%p648_p8)
}
  0x2d   : > { %s805_s12 = smov 64   ;;  %s806_s13 = smov 4  }
  0x2e   : > { %551 = dma.hbm_to_vmem [thread:$0]  (!%p896_p11), %s1116_s2, 256, %s177_s27, [#allocation6], %s805_s12, %s805_s12, %s806_s13  }
  0x2f   : > { %p33_p1 = scmp.ge.s32.totalorder %s32_s29, 2  ;;  %s44_s26 = sadd.s32 1, %s790_s17 }
  0x30   : > { %p51_p2 = scmp.ne.s32.totalorder %s790_s17, %s786_s16  ;;  %p52_p4 = scmp.eq.s32.totalorder %s802_s20, 0 }
  0x31   : > { %s1136_s29 = smov (%p33_p1, %s32_s29), 0  ;;  %p1118_p8 = scmp.eq.s32.totalorder %s868_s21, 1 }
  0x32   : > { %p923_p6 = por %p52_p4, %p51_p2  ;;  %s39_s5 = ssub.s32 %s798_s19, %s1136_s29 }
  0x33   : > { %p929_p10 = por %p1118_p8, %p51_p2  ;;  %p564_p11 = scmp.lt.s32.totalorder %s802_s20, 2 }
  0x34   : > { %p42_p12 = scmp.eq.s32.totalorder %s39_s5, 0  ;;  %s937_s27 = sand.u32 1, %s790_s17  }
  0x35   : > { %s1119_s28 = scalar_select %p929_p10, 1, 0 }
  0x36   : > { %s510_s6 = sshll.u32 %s937_s27, 3  ;;  %s511_s8 = sshll.u32 %s798_s19, 7 }
  0x37   : > { %s941_s7 = scalar_select %p42_p12, %s790_s17, %s44_s26  }
  0x38   : > { %s1120_s0 = sld [smem:[#allocation13_spill]]  ;;  %s197_s12 = scalar_lea.vmem [#allocation2], %s510_s6 }
  0x39   : > { %s205_s13 = sshll.u32 %s197_s12, 4  ;;  %p953_p13 = pnand %p564_p11, %p923_p6  ;;  %s949_s13 = int_to_ptr.vmem [resolvable:$true] %s205_s13 }
  0x3a   : > { %s512_s26 = sshll.u32 %s937_s27, 1  ;;  %s194_s5 = scalar_lea.sflag [#allocation3], %s937_s27 }
  0x3b   : > { %p654_p3 = pneg %p953_p13 }
  0x3e   : > { %s947_s11 = scalar_lea.hbm %s1120_s0, %s511_s8  ;;  %s657_s30 = scalar_lea.hbm %s1120_s0, 256 }
  0x3f   : > { %s652_s8 = scalar_lea.hbm %s947_s11, 128  ;;  %p658_p9 = scmp.lt.u32.totalorder %s947_s11, %s1120_s0 }
  0x40   : > { %p653_p0 = scmp.ne.s32.totalorder %s947_s11, %s652_s8  ;;  %p659_p1 = scmp.lt.u32.totalorder %s657_s30, %s652_s8 }
  0x41   : > { %p661_p4 = scmp.lt.u32.totalorder %s652_s8, %s947_s11 }
  0x42   : > { %p655_p5 = pnand %p654_p3, %p653_p0  ;;  %p660_p2 = por %p659_p1, %p658_p9 }
  0x44   : > { %p656_p7 = pneg %p655_p5  ;;  %p662_p6 = por %p661_p4, %p660_p2 }
  0x46   : > { %p663_p8 = pnand %p662_p6, %p656_p7 }
  0x48   : > { %666 = shalt.err (!%p663_p8)
}
  0x49   : > { %s667_s22 = scalar_lea.vmem %s949_s13, 128  ;;  %s807_s6 = smov [#allocation2]  }
  0x4a   : > { %p668_p11 = scmp.ne.s32.totalorder %s949_s13, %s667_s22  ;;  %s672_s9 = sshll.u32 %s807_s6, 4  ;;  %s673_s9 = int_to_ptr.vmem [resolvable:$false] %s672_s9 }
  0x4b   : > { %s674_s10 = scalar_lea.vmem %s673_s9, 256  ;;  %p675_p5 = scmp.lt.s32.totalorder %s949_s13, %s673_s9 }
  0x4c   : > { %p670_p12 = pnand %p668_p11, %p654_p3  ;;  %p676_p9 = scmp.lt.s32.totalorder %s674_s10, %s667_s22 }
  0x4e   : > { %p671_p0 = pneg %p670_p12  ;;  %p677_p1 = por %p676_p9, %p675_p5 }
  0x50   : > { %p678_p2 = pnand %p677_p1, %p671_p0 }
  0x52   : > { %681 = shalt.err (!%p678_p2)
}
  0x53   : > { %555 = dma.hbm_to_vmem [thread:$0]  (!%p953_p13), %s947_s11, 128, %s949_s13, %s194_s5  }
  0x54   : > { %s513_s8 = sshll.u32 %s798_s19, 5  ;;  %s216_s22 = scalar_lea.vmem [#allocation5], %s512_s26 }
  0x55   : > { %s989_s6 = scalar_lea.hbm %s1102_s1, %s513_s8  ;;  %s223_s9 = sshll.u32 %s216_s22, 4  ;;  %s224_s9 = int_to_ptr.vmem [resolvable:$true] %s223_s9 }
  0x56   : > { %s1122_s10 = sand.u32 1, %s802_s20   ;;  %s682_s2 = scalar_lea.hbm %s989_s6, 32 }
  0x57   : > { %s213_s0 = scalar_lea.sflag [#allocation6], %s1122_s10  ;;  %p683_p7 = scmp.ne.s32.totalorder %s989_s6, %s682_s2 }
  0x58   : > { %s687_s5 = scalar_lea.hbm %s1102_s1, 64  ;;  %p688_p8 = scmp.lt.u32.totalorder %s989_s6, %s1102_s1 }
  0x59   : > { %p685_p4 = pnand %p683_p7, %p654_p3  ;;  %p689_p11 = scmp.lt.u32.totalorder %s687_s5, %s682_s2 }
  0x5a   : > { %p691_p0 = scmp.lt.u32.totalorder %s682_s2, %s989_s6 }
  0x5b   : > { %p686_p6 = pneg %p685_p4  ;;  %p690_p12 = por %p689_p11, %p688_p8 }
  0x5d   : > { %p692_p5 = por %p691_p0, %p690_p12 }
  0x5f   : > { %p693_p9 = pnand %p692_p5, %p686_p6 }
  0x61   : > { %696 = shalt.err (!%p693_p9)
}
  0x62   : > { %s697_s26 = scalar_lea.vmem %s224_s9, 32  ;;  %s808_s30 = smov [#allocation5]  }
  0x63   : > { %p698_p1 = scmp.ne.s32.totalorder %s224_s9, %s697_s26  ;;  %s702_s12 = sshll.u32 %s808_s30, 4  ;;  %s703_s12 = int_to_ptr.vmem [resolvable:$false] %s702_s12 }
  0x64   : > { %s704_s22 = scalar_lea.vmem %s703_s12, 64  ;;  %p705_p4 = scmp.lt.s32.totalorder %s224_s9, %s703_s12 }
  0x65   : > { %p700_p2 = pnand %p698_p1, %p654_p3  ;;  %p706_p10 = scmp.lt.s32.totalorder %s704_s22, %s697_s26 }
  0x67   : > { %p701_p7 = pneg %p700_p2  ;;  %p707_p8 = por %p706_p10, %p705_p4 }
  0x69   : > { %p708_p11 = pnand %p707_p8, %p701_p7 }
  0x6b   : > { %711 = shalt.err (!%p708_p11)
}
  0x6c   : > { %558 = dma.hbm_to_vmem [thread:$0]  (!%p953_p13), %s989_s6, 32, %s224_s9, %s213_s0  }
  0x6d   : > { %p1123_p6 = scmp.ne.s32.totalorder %s1114_s25, 0 }
  0x6e   : > { %s1017_s2 = sand.u32 (!%p1123_p6), 1, %s786_s16   ;;  %p1124_p10 = scmp.ne.s32.totalorder (!%p1123_p6), %s1112_s23, 0 }
  0x6f   : > { %232 = sbr.rel (%p1123_p6) target bundleno = 669 (0x29d), region = 36  ;;  %s515_s10 = sshll.u32 (!%p1123_p6), %s1017_s2, 3 }
  0x70   : > { %s235_s11 = scalar_lea.sflag (!%p1123_p6), [#allocation3], %s1017_s2  ;;  %s238_s13 = scalar_lea.vmem (!%p1123_p6), [#allocation2], %s515_s10 }
  0x76   : > { %765 = dma.done.wait (%p1124_p10), %s235_s11, 128  }
  0x77   : > { %767 = vsyncadd (%p1124_p10), %s235_s11, 4294967168  ;;  %s243_s0 = sand.u32 1, %s868_s21   ;;  %s516_s25 = sshll.u32 %s1017_s2, 1 }
  0x78   : > { %s244_s14 = scalar_lea.sflag [#allocation6], %s243_s0  ;;  %s1029_s6 = scalar_lea.vmem [#allocation5], %s516_s25 }
  0x79   : > { %769 = dma.done.wait (%p1124_p10), %s244_s14, 32  }
  0x7a   : > { %771 = vsyncadd (%p1124_p10), %s244_s14, 4294967264  ;;  %p1125_p13 = scmp.eq.s32.totalorder %s868_s21, 0 }
  0x7c   : > { %773 = dma.done.wait (%p1125_p13), [#allocation6], 256   ;;  %p1126_p3 = pmov %p1125_p13 }
  0x7d   : > { %vm283_vm0 = vcmask 261120   ;;  %v282_v0 = vld [vmem:[%s238_s13] sm:$0xff]  ;;  %v620_v7 = vld [vmem:[#allocation7] sm:$0xff]   ;;  %v809_v8 = vmov 0.0   ;;  %vm810_vm1 = vmmov 0   ;;  %v298_v12 = vlaneseq  ;;  %s524_s9 = sshll.u32 %s794_s18, 7 }
  0x7e   : > { %775 = vsyncadd (%p1126_p3), [#allocation6], 4294967040  ;;  %v284_v1 = vsel %vm283_vm0, %v282_v0, 0.0  ;;  %530 = vmatprep.subr.bf16.mxu0 %v809_v8  ;;  %v621_v9 = vld [vmem:[#allocation7 + $0x8] sm:$0xff]   ;;  %534 = vmatprep.mubr.msk.bf16.mxu0 %vm810_vm1, %v809_v8  ;;  %v296_v16 = vld [vmem:[%s1029_s6] sm:$0x3]  ;;  %s1052_s30 = scalar_lea.hbm %s1105_s4, %s524_s9 }
  0x7f   : > { %285 = vadd.xlane.f32.xlu0 %v284_v1  ;;  %531 = vmatpush3.bf16.msra.mxu0 %v620_v7  ;;  %v299_v14 = vshrl.u32 %v298_v12, 7  ;;  %v522_v25 = vld [vmem:[%s1104_s3] ss:$0 sm:$0xff]  ;;  %s280_s5 = scalar_lea.vmem [#allocation8], %s515_s10  ;;  %vm376_vm2 = vcmask 130048   ;;  %s379_s18 = scalar_lea.sflag [#allocation4], %s1017_s2 }
  0x80   : > { %532 = vmatprep.subr.bf16.mxu0 %v809_v8  ;;  %s393_s27 = sshll.u32 %s280_s5, 4  ;;  %p1127_p0 = scmp.ne.s32.totalorder %s1119_s28, 0  ;;  %s1054_s27 = int_to_ptr.vmem [resolvable:$true] %s393_s27 }
  0x81   : > { %v300_v15 = vsub.s32 1, %v299_v14  ;;  %v305_v17 = vsub.s32 0, %v299_v14  ;;  %s712_s12 = scalar_lea.vmem %s1054_s27, 128  ;;  %s811_s22 = smov [#allocation8]  }
  0x82   : > { %p713_p12 = scmp.ne.s32.totalorder %s1054_s27, %s712_s12  ;;  %s716_s10 = sshll.u32 %s811_s22, 4  ;;  %s717_s10 = int_to_ptr.vmem [resolvable:$false] %s716_s10 }
  0x83   : > { %533 = vmatpush3.bf16.msra.mxu0 %v621_v9  ;;  %v301_v18 = vrot.slane %v296_v16, %v300_v15  ;;  %v306_v21 = vrot.slane %v296_v16, %v305_v17  ;;  %s718_s11 = scalar_lea.vmem %s717_s10, 256  ;;  %p719_p1 = scmp.lt.s32.totalorder %s1054_s27, %s717_s10 }
  0x84   : > { %p714_p5 = pnand %p713_p12, %p1127_p0  ;;  %p720_p2 = scmp.lt.s32.totalorder %s718_s11, %s712_s12 }
  0x86   : > { %p715_p9 = pneg %p714_p5  ;;  %p721_p7 = por %p720_p2, %p719_p1 }
  0x88   : > { %p722_p4 = pnand %p721_p7, %p715_p9 }
 0x10c   : > { %v286_v2 = vpop.xlane.xlu0 %285 }
 0x10d   : > { %v287_v3 = vmul.f32 0.03125, %v286_v2 }
 0x10f   : > { %v288_v4 = vsub.f32 %v282_v0, %v287_v3 }
 0x111   : > { %v289_v5 = vmul.f32 %v288_v4, %v288_v4 }
 0x113   : > { %v290_v6 = vsel %vm283_vm0, %v289_v5, 0.0 }
 0x114   : > { %291 = vadd.xlane.f32.xlu0 %v290_v6 }
 0x1a1   : > { %v292_v10 = vpop.xlane.xlu0 %291 }
 0x1a2   : > { %v293_v11 = vmul.f32 0.03125, %v292_v10 }
 0x1a4   : > { %v294_v13 = vadd.f32 1e-06, %v293_v11 }
 0x1a6   : > { %622 = vrsqrt.f32 %v294_v13 }
 0x1b0   : > { %v623_v19 = vpop.eup %622 }
 0x1b1   : > { %v297_v20 = vmul.f32 %v623_v19, %v288_v4 }
 0x1b3   : > { %v302_v22 = vmul.f32 %v301_v18, %v297_v20 }
 0x1b5   : > { %v307_v23 = vadd.f32 %v306_v21, %v302_v22 }
 0x1b7   : > { %v308_v24 = vpack.c.bf16 %v307_v23, %v307_v23 }
 0x1b9   : > { %535 = vmatmul.mubr.msk.bf16.vlgmr.msra.gmra.mrb[0].mxu0 %vm283_vm0, %v308_v24 }
 0x28c   : > { %v362_v26 = vpop.f32.mrb[0].mxu0 }
 0x28d   : > { %v375_v27 = vadd.f32 %v522_v25, %v362_v26  ;;  %v536_v28 = vpop.f32.mrb[1].mxu0 }
 0x28e   : > { %v365_v29 = vpop.f32.mrb[2].mxu0 }
 0x28f   : > { %v537_v30 = vpop.f32.mrb[3].mxu0  ;;  %377 = vst.msk [vmem:[%s280_s5] sm:$0xff] %vm376_vm2, %v375_v27 }
 0x290   : > { %725 = shalt.err (!%p722_p4)
}
 0x291   : > { %s726_s2 = scalar_lea.hbm %s1052_s30, 128  ;;  %s730_s25 = scalar_lea.hbm %s1105_s4, 256 }
 0x292   : > { %p727_p8 = scmp.ne.s32.totalorder %s1052_s30, %s726_s2  ;;  %p731_p10 = scmp.lt.u32.totalorder %s1052_s30, %s1105_s4 }
 0x293   : > { %p732_p13 = scmp.lt.u32.totalorder %s730_s25, %s726_s2  ;;  %p734_p12 = scmp.lt.u32.totalorder %s726_s2, %s1052_s30 }
 0x294   : > { %p728_p11 = pnand %p727_p8, %p1127_p0 }
 0x295   : > { %p733_p3 = por %p732_p13, %p731_p10 }
 0x296   : > { %p729_p6 = pneg %p728_p11 }
 0x297   : > { %p735_p5 = por %p734_p12, %p733_p3 }
 0x299   : > { %p736_p9 = pnand %p735_p5, %p729_p6 }
 0x29b   : > { %739 = shalt.err (!%p736_p9)
}
 0x29c   : > { %546 = dma.vmem_to_hbm [thread:$0]  (%p1127_p0), %s1054_s27, 128, %s1052_s30, %s379_s18  }
 0x29d PF: > { %s405_s21 = sand.u32 1, %s782_s15   ;;  %p1128_p1 = scmp.ne.s32.totalorder %s1113_s24, 0 }
 0x29e   : > { %p1129_p2 = scmp.ge.s32.totalorder %s802_s20, 2  ;;  %s406_s23 = scalar_lea.sflag [#allocation4], %s405_s21 }
 0x2a0   : > { %p560_p7 = pnand %p1129_p2, %p1128_p1 }
 0x2a2   : > { %777 = dma.done.wait (!%p560_p7), %s406_s23, 128  }
 0x2a3   : > { %779 = vsyncadd (!%p560_p7), %s406_s23, 4294967168  ;;  %s23_s20 = sadd.s32 1, %s802_s20   ;;  %s1130_s15 = smov %s786_s16 }
 0x2a4   : > { %p20_p4 = scmp.ge.s32.totalorder %s23_s20, 4   ;;  %s1131_s16 = smov %s790_s17 }
 0x2a5   : > { %s1132_s17 = smov %s941_s7  ;;  %s1133_s18 = smov %s798_s19 }
 0x2a6   : > { %s1134_s19 = smov %s1136_s29  ;;  %22 = sbr.rel (!%p20_p4) target bundleno = 11 (0xb), region = 98 }
 0x2ad   :  { %411 = vsyncpa [#allocation3], 1 }
 0x2ae   :  { %413 = vsyncpa [#allocation3 + $0x1], 1 }
 0x2af   :  { %414 = vsyncpa [#allocation6], 1 }
 0x2b0   :  { %416 = vsyncpa [#allocation6 + $0x1], 1 }
 0x2b1   :  { %417 = vsyncpa [#allocation4], 1 }
 0x2b2   :  { %419 = vsyncpa [#allocation4 + $0x1], 1 }

</bundles_post_ra>
